<compile_context>
chip_gen: v7x
topology: tpu7x:2x2x1
jax: 0.10.0
libtpu: 0.0.40
codegen_flags: <defaults>
</compile_context>

<pallas_src>
import jax
import jax.numpy as jnp
from jax import lax
from jax.experimental import pallas as pl
from jax.experimental.pallas import tpu as pltpu


def _twinned_q_kernel(s_ref, a_ref, w1s_ref, w1a_ref, w2_ref, aux_ref, o_ref):
    """One grid step = one batch tile; all E ensemble members inside.

    s_ref  : (bt, num_inputs)   f32   natural batch-major layout from HBM
    a_ref  : (bt, num_actions)  f32
    w1s_ref: (E*H, num_inputs)  f32   layer-1 weight, state columns (stacked E)
    w1a_ref: (E*H, num_actions) f32   layer-1 weight, action columns
    w2_ref : (E, H, H)          f32
    aux_ref: (E*H, 4)           f32   col 0 = b1, 1 = b2, 2 = w3 (as column),
                                      3 = b3 (stored in row e*H of member e)
    o_ref  : (E, bt)            f32   lane-dense: batch on the lane axis
    """
    E, H, _ = w2_ref.shape
    nt = (((1,), (1,)), ((), ()))          # contract minor dims:  A @ B.T

    # Layer 1 for all members at once (ensemble stacked into the MXU M dim).
    # The NT form lets the MXU consume the batch-major activation blocks
    # directly; the (E*H, bt) result has the batch on lanes.
    h1 = lax.dot_general(w1s_ref[...], s_ref[...], nt,
                         preferred_element_type=jnp.float32)
    h1 = h1 + lax.dot_general(w1a_ref[...], a_ref[...], nt,
                              preferred_element_type=jnp.float32)
    h1 = jnp.maximum(h1 + aux_ref[:, 0:1], 0.0)            # + b1, ReLU

    for e in range(E):                                     # E is tiny -> unroll
        rows = slice(e * H, (e + 1) * H)
        # Layer 2: standard (H, H) @ (H, bt) MXU matmul, f32 accumulation.
        h2 = jnp.dot(w2_ref[e], h1[rows, :],
                     preferred_element_type=jnp.float32)
        h2 = jnp.maximum(h2 + aux_ref[rows, 1:2], 0.0)     # + b2, ReLU
        # Layer 3 (Linear(H, 1)): VPU multiply + sublane (XLU) reduce instead
        # of an N=1 MXU matmul; the (1, bt) result stays lane-dense.
        q = jnp.sum(h2 * aux_ref[rows, 2:3], axis=0, keepdims=True)
        q = q + aux_ref[e * H:e * H + 1, 3:4]              # + b3
        o_ref[pl.ds(e, 1), :] = q.astype(o_ref.dtype)


def _round_up(x, m):
    return ((x + m - 1) // m) * m


def _choose_batch_tile(batch, hidden, ensemble):
    """Pick the lane (batch) tile: as fat as the VMEM budget allows.

    Per-grid-step overhead (~0.35 us) dwarfs this tiny MLP's per-tile compute,
    so we want few, large tiles.  Dominant per-tile VMEM is the f32
    (E*H, bt)/(H, bt) intermediates plus the double-buffered activation blocks;
    keeping the total under ~12 MiB respects the default scoped-VMEM limit on
    every generation (v5e: 16 MiB scoped; v7x: 64 MiB physical VMEM).
    """
    bytes_per_lane = 4 * (3 * hidden * ensemble + 128)     # conservative bound
    cap = (12 * 1024 * 1024 // bytes_per_lane) // 128 * 128
    cap = max(128, min(8192, cap))
    b128 = _round_up(batch, 128)                            # >=128 lanes: unmasked vst
    if b128 <= cap:
        if b128 >= 2048:
            # v7x has 2 TensorCores: give the "parallel" grid >= 2 tiles.
            return _round_up(b128 // 2, 128)
        return b128
    return cap


@jax.jit
def twinned_q_forward(states, actions, params):
    """Equivalent of TwinnedQNetwork.forward(states, actions).

    Returns q of shape (E, B): q[i] == Q_i(cat([states, actions], dim=1))[:, 0].
    (Use q[:, :, None] if a trailing singleton dim is really needed; the
    lane-dense (E, B) layout avoids a relayout copy on TPU.)
    """
    w1, b1 = params["w1"], params["b1"]                    # (E, H, D_in), (E, H)
    w2, b2 = params["w2"], params["b2"]                    # (E, H, H),    (E, H)
    w3, b3 = params["w3"], params["b3"]                    # (E, 1, H),    (E, 1)
    E, H, d_in = w1.shape
    B, ni = states.shape
    _, na = actions.shape

    # Split W1 into its state/action column blocks (no activation concat
    # needed) and stack the ensemble into the MXU M dimension.
    w1_flat = w1.reshape(E * H, d_in)
    w1s = w1_flat[:, :ni]                                  # (E*H, num_inputs)
    w1a = w1_flat[:, ni:]                                  # (E*H, num_actions)
    # Pack the small per-row params into one VMEM-resident (E*H, 4) array.
    b3_rows = jnp.zeros((E, H), dtype=b3.dtype).at[:, 0].set(b3[:, 0])
    aux = jnp.stack([b1, b2, w3[:, 0, :], b3_rows], axis=-1).reshape(E * H, 4)

    bt = _choose_batch_tile(B, H, E)
    n_tiles = pl.cdiv(B, bt)
    b_pad = n_tiles * bt
    if b_pad != B:                                         # pad batch up to the tile
        states = jnp.pad(states, ((0, b_pad - B), (0, 0)))
        actions = jnp.pad(actions, ((0, b_pad - B), (0, 0)))

    resident2 = lambda i: (0, 0)                           # weights stay in VMEM
    # (Optional tuning: pipeline_mode=pl.Buffered(3) on the activation specs
    #  once bt >= 4096 — verify with a profile before keeping.)
    out = pl.pallas_call(
        _twinned_q_kernel,
        out_shape=jax.ShapeDtypeStruct((E, b_pad), states.dtype),
        grid=(n_tiles,),
        in_specs=[
            pl.BlockSpec((bt, ni), lambda i: (i, 0)),      # states (batch-tiled)
            pl.BlockSpec((bt, na), lambda i: (i, 0)),      # actions (batch-tiled)
            pl.BlockSpec((E * H, ni), resident2),          # W1 state half
            pl.BlockSpec((E * H, na), resident2),          # W1 action half
            pl.BlockSpec((E, H, H), lambda i: (0, 0, 0)),  # W2
            pl.BlockSpec((E * H, 4), resident2),           # packed b1/b2/w3/b3
        ],
        out_specs=pl.BlockSpec((E, bt), lambda i: (0, i)), # lane-dense output
        compiler_params=pltpu.CompilerParams(
            dimension_semantics=("parallel",)),            # batch tiles independent
    )(states, actions, w1s, w1a, w2, aux)

    return out[:, :B]                                      # (E, B)


def init_twinned_q_params(key, num_inputs, num_actions, hidden, num_ensemble=2,
                          dtype=jnp.float32):
    """Xavier-uniform weights (PyTorch (out, in) orientation), zero biases."""
    d_in = num_inputs + num_actions

    def xavier(k, fan_out, fan_in):
        limit = jnp.sqrt(6.0 / (fan_in + fan_out))
        return jax.random.uniform(k, (fan_out, fan_in), dtype, -limit, limit)

    w1s, w2s, w3s = [], [], []
    for i in range(num_ensemble):
        k1, k2, k3 = jax.random.split(jax.random.fold_in(key, i), 3)
        w1s.append(xavier(k1, hidden, d_in))
        w2s.append(xavier(k2, hidden, hidden))
        w3s.append(xavier(k3, 1, hidden))

    return {
        "w1": jnp.stack(w1s),                               # (E, H, D_in)
        "b1": jnp.zeros((num_ensemble, hidden), dtype),     # (E, H)
        "w2": jnp.stack(w2s),                               # (E, H, H)
        "b2": jnp.zeros((num_ensemble, hidden), dtype),     # (E, H)
        "w3": jnp.stack(w3s),                               # (E, 1, H)
        "b3": jnp.zeros((num_ensemble, 1), dtype),          # (E, 1)
    }


def _reference_forward(states, actions, params):
    """Pure f32 JAX reference, returns (E, B)."""
    x = jnp.concatenate([states, actions], axis=1)
    outs = []
    for e in range(params["w1"].shape[0]):
        h1 = jax.nn.relu(x @ params["w1"][e].T + params["b1"][e])
        h2 = jax.nn.relu(h1 @ params["w2"][e].T + params["b2"][e])
        q = h2 @ params["w3"][e].T + params["b3"][e]        # (B, 1)
        outs.append(q[:, 0])
    return jnp.stack(outs)                                  # (E, B)


# TODO(synk): BaseNetwork.save/load (torch checkpoint I/O) has no kernel
# equivalent; parameters are plain JAX pytrees here.

if __name__ == "__main__":
    # Small shapes consistent with the module's forward:
    # states: (B, num_inputs), actions: (B, num_actions), hidden_units -> 32.
    B, NUM_INPUTS, NUM_ACTIONS, HIDDEN, NUM_ENSEMBLE = 8, 16, 8, 32, 2

    key = jax.random.PRNGKey(0)
    k_s, k_a, k_p = jax.random.split(key, 3)
    states = jax.random.normal(k_s, (B, NUM_INPUTS), jnp.float32)
    actions = jax.random.normal(k_a, (B, NUM_ACTIONS), jnp.float32)
    params = init_twinned_q_params(k_p, NUM_INPUTS, NUM_ACTIONS, HIDDEN,
                                   NUM_ENSEMBLE)

    q = jax.block_until_ready(twinned_q_forward(states, actions, params))
    q_ref = _reference_forward(states, actions, params)

    assert q.shape == (NUM_ENSEMBLE, B)
    assert jnp.allclose(q, q_ref, atol=2e-2, rtol=2e-2), "mismatch vs reference"

    print("KERNEL_OK")
</pallas_src>

<mosaic_0001>
module attributes {stable_mosaic.version = 11 : i64} {
  func.func @_twinned_q_kernel(%arg0: i32, %arg1: memref<128x16xf32, #tpu.memory_space<vmem>>, %arg2: memref<128x8xf32, #tpu.memory_space<vmem>>, %arg3: memref<64x16xf32, #tpu.memory_space<vmem>>, %arg4: memref<64x8xf32, #tpu.memory_space<vmem>>, %arg5: memref<2x32x32xf32, #tpu.memory_space<vmem>>, %arg6: memref<64x4xf32, #tpu.memory_space<vmem>>, %arg7: memref<2x128xf32, #tpu.memory_space<vmem>>) attributes {dimension_semantics = [#tpu.dimension_semantics<parallel>], iteration_bounds = array<i64: 1>, scalar_prefetch = 0 : i64, scratch_operands = 0 : i64, tpu.core_type = #tpu.core_type<tc>, window_params = [{transform_indices = @transform_0, window_bounds = array<i64: 128, 16>}, {transform_indices = @transform_1, window_bounds = array<i64: 128, 8>}, {pipeline_mode = #tpu.pipeline_mode<synchronous>, transform_indices = @transform_2, window_bounds = array<i64: 64, 16>}, {pipeline_mode = #tpu.pipeline_mode<synchronous>, transform_indices = @transform_3, window_bounds = array<i64: 64, 8>}, {pipeline_mode = #tpu.pipeline_mode<synchronous>, transform_indices = @transform_4, window_bounds = array<i64: 2, 32, 32>}, {pipeline_mode = #tpu.pipeline_mode<synchronous>, transform_indices = @transform_5, window_bounds = array<i64: 64, 4>}, {transform_indices = @transform_6, window_bounds = array<i64: 2, 128>}]} {
    %c0 = arith.constant 0 : index
    %c0_0 = arith.constant 0 : index
    %0 = vector.load %arg3[%c0, %c0_0] : memref<64x16xf32, #tpu.memory_space<vmem>>, vector<64x16xf32>
    %c0_1 = arith.constant 0 : index
    %c0_2 = arith.constant 0 : index
    %1 = vector.load %arg1[%c0_1, %c0_2] : memref<128x16xf32, #tpu.memory_space<vmem>>, vector<128x16xf32>
    %cst = arith.constant dense<0.000000e+00> : vector<64x128xf32>
    %2 = tpu.matmul %0, %1, %cst {dimension_numbers = #tpu.dot_dimension_numbers<[1], [1], [0], [0], [0, 0, 1, 0], [], []>} : vector<64x16xf32>, vector<128x16xf32>, vector<64x128xf32> -> vector<64x128xf32>
    %c0_3 = arith.constant 0 : index
    %c0_4 = arith.constant 0 : index
    %3 = vector.load %arg4[%c0_3, %c0_4] : memref<64x8xf32, #tpu.memory_space<vmem>>, vector<64x8xf32>
    %c0_5 = arith.constant 0 : index
    %c0_6 = arith.constant 0 : index
    %4 = vector.load %arg2[%c0_5, %c0_6] : memref<128x8xf32, #tpu.memory_space<vmem>>, vector<128x8xf32>
    %cst_7 = arith.constant dense<0.000000e+00> : vector<64x128xf32>
    %5 = tpu.matmul %3, %4, %cst_7 {dimension_numbers = #tpu.dot_dimension_numbers<[1], [1], [0], [0], [0, 0, 1, 0], [], []>} : vector<64x8xf32>, vector<128x8xf32>, vector<64x128xf32> -> vector<64x128xf32>
    %6 = arith.addf %2, %5 : vector<64x128xf32>
    %c0_8 = arith.constant 0 : index
    %c0_9 = arith.constant 0 : index
    %7 = vector.load %arg6[%c0_8, %c0_9] : memref<64x4xf32, #tpu.memory_space<vmem>>, vector<64x1xf32>
    %8 = vector.broadcast %7 : vector<64x1xf32> to vector<64x128xf32>
    %9 = arith.addf %6, %8 : vector<64x128xf32>
    %cst_10 = arith.constant 0.000000e+00 : f32
    %10 = vector.broadcast %cst_10 : f32 to vector<64x128xf32>
    %11 = arith.maximumf %9, %10 : vector<64x128xf32>
    %c0_11 = arith.constant 0 : index
    %c0_12 = arith.constant 0 : index
    %c0_13 = arith.constant 0 : index
    %12 = vector.load %arg5[%c0_11, %c0_12, %c0_13] : memref<2x32x32xf32, #tpu.memory_space<vmem>>, vector<1x32x32xf32>
    %13 = vector.shape_cast %12 : vector<1x32x32xf32> to vector<32x32xf32>
    %14 = vector.extract_strided_slice %11 {offsets = [0, 0], sizes = [32, 128], strides = [1, 1]} : vector<64x128xf32> to vector<32x128xf32>
    %cst_14 = arith.constant dense<0.000000e+00> : vector<32x128xf32>
    %15 = tpu.matmul %13, %14, %cst_14 {dimension_numbers = #tpu.dot_dimension_numbers<[1], [0], [0], [1], [0, 0, 1, 1], [], []>} : vector<32x32xf32>, vector<32x128xf32>, vector<32x128xf32> -> vector<32x128xf32>
    %c0_15 = arith.constant 0 : index
    %c1 = arith.constant 1 : index
    %16 = vector.load %arg6[%c0_15, %c1] : memref<64x4xf32, #tpu.memory_space<vmem>>, vector<32x1xf32>
    %17 = vector.broadcast %16 : vector<32x1xf32> to vector<32x128xf32>
    %18 = arith.addf %15, %17 : vector<32x128xf32>
    %cst_16 = arith.constant 0.000000e+00 : f32
    %19 = vector.broadcast %cst_16 : f32 to vector<32x128xf32>
    %20 = arith.maximumf %18, %19 : vector<32x128xf32>
    %c0_17 = arith.constant 0 : index
    %c2 = arith.constant 2 : index
    %21 = vector.load %arg6[%c0_17, %c2] : memref<64x4xf32, #tpu.memory_space<vmem>>, vector<32x1xf32>
    %22 = vector.broadcast %21 : vector<32x1xf32> to vector<32x128xf32>
    %23 = arith.mulf %20, %22 : vector<32x128xf32>
    %cst_18 = arith.constant dense<0.000000e+00> : vector<128xf32>
    %24 = vector.multi_reduction <add>, %23, %cst_18 [0] : vector<32x128xf32> to vector<128xf32>
    %25 = vector.shape_cast %24 : vector<128xf32> to vector<1x128xf32>
    %c0_19 = arith.constant 0 : index
    %c3 = arith.constant 3 : index
    %26 = vector.load %arg6[%c0_19, %c3] : memref<64x4xf32, #tpu.memory_space<vmem>>, vector<1x1xf32>
    %27 = vector.broadcast %26 : vector<1x1xf32> to vector<1x128xf32>
    %28 = arith.addf %25, %27 : vector<1x128xf32>
    %c0_20 = arith.constant 0 : index
    %c0_21 = arith.constant 0 : index
    %29 = vector.load %arg7[%c0_20, %c0_21] : memref<2x128xf32, #tpu.memory_space<vmem>>, vector<1x128xf32>
    tpu.vector_store %arg7[%c0_20, %c0_21], %28 {strides = array<i32>} : memref<2x128xf32, #tpu.memory_space<vmem>>, vector<1x128xf32>,
    %c1_22 = arith.constant 1 : index
    %c0_23 = arith.constant 0 : index
    %c0_24 = arith.constant 0 : index
    %30 = vector.load %arg5[%c1_22, %c0_23, %c0_24] : memref<2x32x32xf32, #tpu.memory_space<vmem>>, vector<1x32x32xf32>
    %31 = vector.shape_cast %30 : vector<1x32x32xf32> to vector<32x32xf32>
    %32 = vector.extract_strided_slice %11 {offsets = [32, 0], sizes = [32, 128], strides = [1, 1]} : vector<64x128xf32> to vector<32x128xf32>
    %cst_25 = arith.constant dense<0.000000e+00> : vector<32x128xf32>
    %33 = tpu.matmul %31, %32, %cst_25 {dimension_numbers = #tpu.dot_dimension_numbers<[1], [0], [0], [1], [0, 0, 1, 1], [], []>} : vector<32x32xf32>, vector<32x128xf32>, vector<32x128xf32> -> vector<32x128xf32>
    %c32 = arith.constant 32 : index
    %c1_26 = arith.constant 1 : index
    %34 = vector.load %arg6[%c32, %c1_26] : memref<64x4xf32, #tpu.memory_space<vmem>>, vector<32x1xf32>
    %35 = vector.broadcast %34 : vector<32x1xf32> to vector<32x128xf32>
    %36 = arith.addf %33, %35 : vector<32x128xf32>
    %cst_27 = arith.constant 0.000000e+00 : f32
    %37 = vector.broadcast %cst_27 : f32 to vector<32x128xf32>
    %38 = arith.maximumf %36, %37 : vector<32x128xf32>
    %c32_28 = arith.constant 32 : index
    %c2_29 = arith.constant 2 : index
    %39 = vector.load %arg6[%c32_28, %c2_29] : memref<64x4xf32, #tpu.memory_space<vmem>>, vector<32x1xf32>
    %40 = vector.broadcast %39 : vector<32x1xf32> to vector<32x128xf32>
    %41 = arith.mulf %38, %40 : vector<32x128xf32>
    %cst_30 = arith.constant dense<0.000000e+00> : vector<128xf32>
    %42 = vector.multi_reduction <add>, %41, %cst_30 [0] : vector<32x128xf32> to vector<128xf32>
    %43 = vector.shape_cast %42 : vector<128xf32> to vector<1x128xf32>
    %c32_31 = arith.constant 32 : index
    %c3_32 = arith.constant 3 : index
    %44 = vector.load %arg6[%c32_31, %c3_32] : memref<64x4xf32, #tpu.memory_space<vmem>>, vector<1x1xf32>
    %45 = vector.broadcast %44 : vector<1x1xf32> to vector<1x128xf32>
    %46 = arith.addf %43, %45 : vector<1x128xf32>
    %c1_33 = arith.constant 1 : index
    %c0_34 = arith.constant 0 : index
    %47 = vector.load %arg7[%c1_33, %c0_34] : memref<2x128xf32, #tpu.memory_space<vmem>>, vector<1x128xf32>
    tpu.vector_store %arg7[%c1_33, %c0_34], %46 {strides = array<i32>} : memref<2x128xf32, #tpu.memory_space<vmem>>, vector<1x128xf32>,
    return
  }
  func.func @transform_0(%arg0: i32) -> (i32, i32) {
    %c0_i32 = arith.constant 0 : i32
    %c0_i32_0 = arith.constant 0 : i32
    return %arg0, %c0_i32 : i32, i32
  }
  func.func @transform_1(%arg0: i32) -> (i32, i32) {
    %c0_i32 = arith.constant 0 : i32
    %c0_i32_0 = arith.constant 0 : i32
    return %arg0, %c0_i32 : i32, i32
  }
  func.func @transform_2(%arg0: i32) -> (i32, i32) {
    %c0_i32 = arith.constant 0 : i32
    %c0_i32_0 = arith.constant 0 : i32
    %c0_i32_1 = arith.constant 0 : i32
    return %c0_i32, %c0_i32_0 : i32, i32
  }
  func.func @transform_3(%arg0: i32) -> (i32, i32) {
    %c0_i32 = arith.constant 0 : i32
    %c0_i32_0 = arith.constant 0 : i32
    %c0_i32_1 = arith.constant 0 : i32
    return %c0_i32, %c0_i32_0 : i32, i32
  }
  func.func @transform_4(%arg0: i32) -> (i32, i32, i32) {
    %c0_i32 = arith.constant 0 : i32
    %c0_i32_0 = arith.constant 0 : i32
    %c0_i32_1 = arith.constant 0 : i32
    %c0_i32_2 = arith.constant 0 : i32
    return %c0_i32, %c0_i32_0, %c0_i32_1 : i32, i32, i32
  }
  func.func @transform_5(%arg0: i32) -> (i32, i32) {
    %c0_i32 = arith.constant 0 : i32
    %c0_i32_0 = arith.constant 0 : i32
    %c0_i32_1 = arith.constant 0 : i32
    return %c0_i32, %c0_i32_0 : i32, i32
  }
  func.func @transform_6(%arg0: i32) -> (i32, i32) {
    %c0_i32 = arith.constant 0 : i32
    %c0_i32_0 = arith.constant 0 : i32
    return %c0_i32, %arg0 : i32, i32
  }
}

</mosaic_0001>

<bundles_post_ra>
// kernel: twinned_q_forward.1
= control target key start
LH: loop header
LB: loop body
LE: loop exit
PB: predicated region body
PF: predicated region fallthrough
CT: control target
= control target key end

     0   :  { %vm72_vm0 = vcmask 64512   ;;  %vm250_vm1 = vcmask 130048   ;;  %v1239_v7 = vmov 0   ;;  %s1629_s0 = inlined_call_operand.vmem [shape: f32[128,16], index: 0, kind: input, shape index: {}]   ;;  %s1630_s1 = inlined_call_operand.vmem [shape: f32[128,8], index: 1, kind: input, shape index: {}]   ;;  %s1631_s2 = inlined_call_operand.vmem [shape: f32[64,16], index: 2, kind: input, shape index: {}]   ;;  %s1632_s3 = inlined_call_operand.vmem [shape: f32[64,8], index: 3, kind: input, shape index: {}]   ;;  %s1633_s4 = inlined_call_operand.vmem [shape: f32[2,32,32], index: 4, kind: input, shape index: {}]   ;;  %s1634_s5 = inlined_call_operand.vmem [shape: f32[64,4], index: 5, kind: input, shape index: {}]   ;;  %s1635_s6 = inlined_call_operand.hbm [shape: f32[2,128], index: 6, kind: output, shape index: {}]  }
   0x1   :  { %v56_v0 = vld [vmem:[%s1630_s1] sm:$0xff]  ;;  %v57_v1 = vld [vmem:[%s1630_s1 + $0x8] sm:$0xff]  ;;  %vm1290_vm2 = vmpackc.low %vm72_vm0, %vm72_vm0  ;;  %1206 = vset.pattern.permute.xlu1 %v1239_v7  ;;  %1205 = vset.pattern.permute.xlu0 %v1239_v7 }
   0x2   :  { %v32_v2 = vld [vmem:[%s1629_s0] sm:$0xff]  ;;  %v1080_v3 = vpack.c.bf16 %v57_v1, %v56_v0  ;;  %v33_v5 = vld [vmem:[%s1629_s0 + $0x8] sm:$0xff]  ;;  %v58_v6 = vld [vmem:[%s1630_s1 + $0x10] sm:$0xff] }
   0x3   :  { %v1128_v8 = vpack.c.bf16 %v33_v5, %v32_v2  ;;  %vm1302_vm3 = vmpackc.low %vm250_vm1, %vm250_vm1  ;;  %v59_v10 = vld [vmem:[%s1630_s1 + $0x18] sm:$0xff]  ;;  %v34_v11 = vld [vmem:[%s1629_s0 + $0x10] sm:$0xff] }
   0x4   :  { %1082 = vmatprep.subr.msk.bf16.mxu1 %vm1290_vm2, %v1080_v3  ;;  %v1086_v12 = vpack.c.bf16 %v59_v10, %v58_v6  ;;  %v35_v13 = vld [vmem:[%s1629_s0 + $0x18] sm:$0xff]  ;;  %v60_v15 = vld [vmem:[%s1630_s1 + $0x20] sm:$0xff]  ;;  %v61_v16 = vld [vmem:[%s1630_s1 + $0x28] sm:$0xff] }
   0x5   :  { %1130 = vmatprep.subr.msk.bf16.mxu0 %vm1302_vm3, %v1128_v8  ;;  %1085 = vmatpush3.bf16.xpose.msk.msra.mxu1 %vm1290_vm2, %v1080_v3  ;;  %v1134_v14 = vpack.c.bf16 %v35_v13, %v34_v11  ;;  %v36_v17 = vld [vmem:[%s1629_s0 + $0x20] sm:$0xff]  ;;  %v37_v18 = vld [vmem:[%s1629_s0 + $0x28] sm:$0xff]  ;;  %v1092_v19 = vpack.c.bf16 %v61_v16, %v60_v15  ;;  %v62_v23 = vld [vmem:[%s1630_s1 + $0x30] sm:$0xff] }
   0x6   :  { %1133 = vmatpush3.bf16.xpose.msk.msra.mxu0 %vm1302_vm3, %v1128_v8  ;;  %1088 = vmatprep.subr.msk.bf16.mxu1 %vm1290_vm2, %v1086_v12  ;;  %v1140_v20 = vpack.c.bf16 %v37_v18, %v36_v17  ;;  %v48_v21 = vld [vmem:[%s1632_s3] sm:$0xff]  ;;  %v63_v24 = vld [vmem:[%s1630_s1 + $0x38] sm:$0xff]  ;;  %v38_v25 = vld [vmem:[%s1629_s0 + $0x30] sm:$0xff] }
   0x7   :  { %1136 = vmatprep.subr.msk.bf16.mxu0 %vm1302_vm3, %v1134_v14  ;;  %v24_v22 = vld [vmem:[%s1631_s2] sm:$0xff]  ;;  %996 = vmatprep.mubr.msk.f32.mxu1 %vm72_vm0, %v48_v21  ;;  %v39_v26 = vld [vmem:[%s1629_s0 + $0x38] sm:$0xff]  ;;  %v1098_v28 = vpack.c.bf16 %v63_v24, %v62_v23  ;;  %v1382_v31 = vld [vmem:[%s1634_s5 + $0x28] sm:$0xff] }
   0x8   :  { %1040 = vmatprep.mubr.msk.f32.mxu0 %vm250_vm1, %v24_v22  ;;  %v1370_v27 = vld [vmem:[%s1634_s5 + $0x20] sm:$0xff]  ;;  %v1146_v30 = vpack.c.bf16 %v39_v26, %v38_v25 }
   0x9   :  { %458 = vperm.xlu1 %1206, %v1370_v27   ;;  %v1376_v29 = vld [vmem:[%s1634_s5] sm:$0xff] }
   0xa   :  { %438 = vperm.xlu0 %1205, %v1376_v29  }
   0xd   :  { %1091 = vmatpush3.bf16.xpose.msk.msra.mxu1 %vm1290_vm2, %v1086_v12 }
   0xe   :  { %1139 = vmatpush3.bf16.xpose.msk.msra.mxu0 %vm1302_vm3, %v1134_v14  ;;  %1094 = vmatprep.subr.msk.bf16.mxu1 %vm1290_vm2, %v1092_v19 }
   0xf   :  { %1142 = vmatprep.subr.msk.bf16.mxu0 %vm1302_vm3, %v1140_v20 }
  0x10   :  { %11 = vsyncpa [#allocation3], 0  ;;  %v1389_v32 = vld [vmem:[%s1634_s5 + $0x8] sm:$0xff]  ;;  %v64_v33 = vld [vmem:[%s1630_s1 + $0x40] sm:$0xff]  ;;  %463 = vperm.xlu1 %1206, %v1382_v31   ;;  %vm520_vm4 = vcmask 261120   ;;  %v1240_v13 = vmov 1  }
  0x11   :  { %v65_v34 = vld [vmem:[%s1630_s1 + $0x48] sm:$0xff]  ;;  %v40_v35 = vld [vmem:[%s1629_s0 + $0x40] sm:$0xff]  ;;  %443 = vperm.xlu0 %1205, %v1389_v32   ;;  %v1414_v37 = vld [vmem:[%s1634_s5 + $0x18] sm:$0xff]  ;;  %v1241_v14 = vmov 2   ;;  %v1242_v16 = vmov 3  }
  0x12   :  { %v41_v36 = vld [vmem:[%s1629_s0 + $0x48] sm:$0xff]  ;;  %v1419_v38 = vld [vmem:[%s1634_s5 + $0x10] sm:$0xff]  ;;  %v1104_v39 = vpack.c.bf16 %v65_v34, %v64_v33  ;;  %v1426_v41 = vld [vmem:[%s1634_s5 + $0x38] sm:$0xff] }
  0x13   :  { %v1152_v40 = vpack.c.bf16 %v41_v36, %v40_v35  ;;  %v1433_v42 = vld [vmem:[%s1634_s5 + $0x30] sm:$0xff]  ;;  %v67_v44 = vld [vmem:[%s1630_s1 + $0x58] sm:$0xff]  ;;  %v68_v49 = vld [vmem:[%s1630_s1 + $0x60] sm:$0xff] }
  0x14   :  { %453 = vperm.xlu1 %1206, %v1414_v37   ;;  %v66_v43 = vld [vmem:[%s1630_s1 + $0x50] sm:$0xff]  ;;  %v43_v46 = vld [vmem:[%s1629_s0 + $0x58] sm:$0xff]  ;;  %v69_v50 = vld [vmem:[%s1630_s1 + $0x68] sm:$0xff] }
  0x15   :  { %1097 = vmatpush3.bf16.xpose.msk.msra.mxu1 %vm1290_vm2, %v1092_v19  ;;  %448 = vperm.xlu0 %1205, %v1419_v38   ;;  %v42_v45 = vld [vmem:[%s1629_s0 + $0x50] sm:$0xff]  ;;  %v1110_v47 = vpack.c.bf16 %v67_v44, %v66_v43  ;;  %v44_v51 = vld [vmem:[%s1629_s0 + $0x60] sm:$0xff]  ;;  %v45_v52 = vld [vmem:[%s1629_s0 + $0x68] sm:$0xff]  ;;  %v1116_v53 = vpack.c.bf16 %v69_v50, %v68_v49 }
  0x16   :  { %1145 = vmatpush3.bf16.xpose.msk.msra.mxu0 %vm1302_vm3, %v1140_v20  ;;  %1100 = vmatprep.subr.msk.bf16.mxu1 %vm1290_vm2, %v1098_v28  ;;  %v1158_v48 = vpack.c.bf16 %v43_v46, %v42_v45  ;;  %v1164_v54 = vpack.c.bf16 %v45_v52, %v44_v51  ;;  %v70_v55 = vld [vmem:[%s1630_s1 + $0x70] sm:$0xff]  ;;  %v71_v56 = vld [vmem:[%s1630_s1 + $0x78] sm:$0xff]  ;;  %v49_v61 = vld [vmem:[%s1632_s3 + $0x8] sm:$0xff] }
  0x17   :  { %1148 = vmatprep.subr.msk.bf16.mxu0 %vm1302_vm3, %v1146_v30  ;;  %v46_v57 = vld [vmem:[%s1629_s0 + $0x70] sm:$0xff]  ;;  %v47_v58 = vld [vmem:[%s1629_s0 + $0x78] sm:$0xff]  ;;  %v1122_v59 = vpack.c.bf16 %v71_v56, %v70_v55  ;;  %v25_v62 = vld [vmem:[%s1631_s2 + $0x8] sm:$0xff] }
  0x18   :  { %473 = vperm.xlu1 %1206, %v1426_v41   ;;  %v1170_v60 = vpack.c.bf16 %v47_v58, %v46_v57  ;;  %v50_v63 = vld [vmem:[%s1632_s3 + $0x10] sm:$0xff]  ;;  %v51_v1 = vld [vmem:[%s1632_s3 + $0x18] sm:$0xff]  ;;  %v52_v3 = vld [vmem:[%s1632_s3 + $0x20] sm:$0xff] }
  0x19   :  { %468 = vperm.xlu0 %1205, %v1433_v42   ;;  %v26_v0 = vld [vmem:[%s1631_s2 + $0x10] sm:$0xff]  ;;  %v27_v2 = vld [vmem:[%s1631_s2 + $0x18] sm:$0xff]  ;;  %v28_v4 = vld [vmem:[%s1631_s2 + $0x20] sm:$0xff] }
  0x1a   :  { %v53_v5 = vld [vmem:[%s1632_s3 + $0x28] sm:$0xff]  ;;  %v54_v7 = vld [vmem:[%s1632_s3 + $0x30] sm:$0xff]  ;;  %v55_v9 = vld [vmem:[%s1632_s3 + $0x38] sm:$0xff] }
  0x1b   :  { %v29_v6 = vld [vmem:[%s1631_s2 + $0x28] sm:$0xff]  ;;  %v30_v8 = vld [vmem:[%s1631_s2 + $0x30] sm:$0xff]  ;;  %v31_v10 = vld [vmem:[%s1631_s2 + $0x38] sm:$0xff] }
  0x1c   :  { %v492_v11 = vld [vmem:[%s1633_s4] sm:$0xff]  ;;  %1208 = vset.pattern.permute.xlu1 %v1240_v13 }
  0x1d   :  { %1103 = vmatpush3.bf16.xpose.msk.msra.mxu1 %vm1290_vm2, %v1098_v28  ;;  %v892_v12 = vld [vmem:[%s1633_s4 + $0x20] sm:$0xff]  ;;  %1207 = vset.pattern.permute.xlu0 %v1240_v13 }
  0x1e   :  { %1151 = vmatpush3.bf16.xpose.msk.msra.mxu0 %vm1302_vm3, %v1146_v30  ;;  %1106 = vmatprep.subr.msk.bf16.mxu1 %vm1290_vm2, %v1104_v39  ;;  %v651_v15 = vld [vmem:[%s1634_s5] sm:$0x1] }
  0x1f   :  { %1154 = vmatprep.subr.msk.bf16.mxu0 %vm1302_vm3, %v1152_v40  ;;  %507 = vperm.xlu1 %1208, %v1389_v32   ;;  %v818_v17 = vld [vmem:[%s1634_s5 + $0x20] sm:$0x1] }
  0x20   :  { %502 = vperm.xlu0 %1207, %v1376_v29  }
  0x23   :  { %670 = vperm.xlu1 %1208, %v1370_v27  }
  0x24   :  { %675 = vperm.xlu0 %1207, %v1382_v31  }
  0x25   :  { %1109 = vmatpush3.bf16.xpose.msk.msra.mxu1 %vm1290_vm2, %v1104_v39 }
  0x26   :  { %1157 = vmatpush3.bf16.xpose.msk.msra.mxu0 %vm1302_vm3, %v1152_v40  ;;  %1112 = vmatprep.subr.msk.bf16.mxu1 %vm1290_vm2, %v1110_v47 }
  0x27   :  { %1160 = vmatprep.subr.msk.bf16.mxu0 %vm1302_vm3, %v1158_v48  ;;  %512 = vperm.xlu1 %1208, %v1419_v38  }
  0x28   :  { %680 = vperm.xlu0 %1207, %v1433_v42  }
  0x2b   :  { %517 = vperm.xlu1 %1208, %v1414_v37  }
  0x2c   :  { %1209 = vset.pattern.permute.xlu0 %v1241_v14 }
  0x2d   :  { %1115 = vmatpush3.bf16.xpose.msk.msra.mxu1 %vm1290_vm2, %v1110_v47  ;;  %623 = vperm.xlu0 %1209, %v1376_v29  }
  0x2e   :  { %1163 = vmatpush3.bf16.xpose.msk.msra.mxu0 %vm1302_vm3, %v1158_v48  ;;  %1118 = vmatprep.subr.msk.bf16.mxu1 %vm1290_vm2, %v1116_v53 }
  0x2f   :  { %1166 = vmatprep.subr.msk.bf16.mxu0 %vm1302_vm3, %v1164_v54  ;;  %1210 = vset.pattern.permute.xlu1 %v1241_v14 }
  0x30   :  { %627 = vperm.xlu1 %1210, %v1389_v32  }
  0x31   :  { %790 = vperm.xlu0 %1209, %v1370_v27  }
  0x34   :  { %1211 = vset.pattern.permute.xlu1 %v1240_v13 }
  0x35   :  { %1121 = vmatpush3.bf16.xpose.msk.msra.mxu1 %vm1290_vm2, %v1116_v53  ;;  %631 = vperm.xlu0 %1209, %v1419_v38  }
  0x36   :  { %1169 = vmatpush3.bf16.xpose.msk.msra.mxu0 %vm1302_vm3, %v1164_v54  ;;  %1124 = vmatprep.subr.msk.bf16.mxu1 %vm1290_vm2, %v1122_v59 }
  0x37   :  { %1172 = vmatprep.subr.msk.bf16.mxu0 %vm1302_vm3, %v1170_v60  ;;  %685 = vperm.xlu1 %1211, %v1426_v41  }
  0x39   :  { %635 = vperm.xlu0 %1209, %v1414_v37  }
  0x3b   :  { %1212 = vset.pattern.permute.xlu1 %v1241_v14 }
  0x3c   :  { %794 = vperm.xlu1 %1212, %v1382_v31  }
  0x3d   :  { %1127 = vmatpush3.bf16.xpose.msk.msra.mxu1 %vm1290_vm2, %v1122_v59  ;;  %1213 = vset.pattern.permute.xlu0 %v1242_v16 }
  0x3e   :  { %1175 = vmatpush3.bf16.xpose.msk.msra.mxu0 %vm1302_vm3, %v1170_v60  ;;  %654 = vperm.xlu0 %1213, %v651_v15  }
  0x40   :  { %798 = vperm.xlu1 %1212, %v1433_v42  }
  0x44   :  { %997 = vmatmul.mubr.msk.f32.vlgmr.msra.gmra.mrb[0].mxu1 %vm72_vm0, %v49_v61  ;;  %802 = vperm.xlu1 %1212, %v1426_v41  }
  0x45   :  { %1041 = vmatmul.mubr.msk.f32.vlgmr.msra.gmra.mrb[0].mxu0 %vm250_vm1, %v25_v62  ;;  %999 = vmatprep.mubr.msk.f32.mxu1 %vm72_vm0, %v50_v63 }
  0x46   :  { %1043 = vmatprep.mubr.msk.f32.mxu0 %vm250_vm1, %v26_v0 }
  0x48   :  { %1000 = vmatmul.mubr.msk.f32.gmra.mrb[2].mxu1 %vm72_vm0, %v51_v1  ;;  %1214 = vset.pattern.permute.xlu1 %v1242_v16  ;;  %v493_v1 = vld [vmem:[%s1633_s4 + $0x8] sm:$0xff] }
  0x49   :  { %1044 = vmatmul.mubr.msk.f32.gmra.mrb[2].mxu0 %vm250_vm1, %v27_v2  ;;  %1002 = vmatprep.mubr.msk.f32.mxu1 %vm72_vm0, %v52_v3 }
  0x4a   :  { %1046 = vmatprep.mubr.msk.f32.mxu0 %vm250_vm1, %v28_v4  ;;  %821 = vperm.xlu1 %1214, %v818_v17   ;;  %v494_v4 = vld [vmem:[%s1633_s4 + $0x10] sm:$0xff] }
  0x4c   :  { %1003 = vmatmul.mubr.msk.f32.gmra.mrb[4].mxu1 %vm72_vm0, %v53_v5 }
  0x4d   :  { %1047 = vmatmul.mubr.msk.f32.gmra.mrb[4].mxu0 %vm250_vm1, %v29_v6  ;;  %1005 = vmatprep.mubr.msk.f32.mxu1 %vm72_vm0, %v54_v7  ;;  %v495_v7 = vld [vmem:[%s1633_s4 + $0x18] sm:$0xff] }
  0x4e   :  { %1049 = vmatprep.mubr.msk.f32.mxu0 %vm250_vm1, %v30_v8 }
  0x50   :  { %1006 = vmatmul.mubr.msk.f32.gmra.mrb[6].mxu1 %vm72_vm0, %v55_v9  ;;  %v893_v9 = vld [vmem:[%s1633_s4 + $0x28] sm:$0xff] }
  0x51   :  { %1050 = vmatmul.mubr.msk.f32.gmra.mrb[6].mxu0 %vm250_vm1, %v31_v10  ;;  %1074 = vmatprep.mubr.msk.f32.mxu1 %vm520_vm4, %v892_v12  ;;  %v894_v10 = vld [vmem:[%s1633_s4 + $0x30] sm:$0xff] }
  0x52   :  { %1060 = vmatprep.mubr.msk.f32.mxu0 %vm520_vm4, %v492_v11  ;;  %v895_v11 = vld [vmem:[%s1633_s4 + $0x38] sm:$0xff]  ;;  %s1243_s4 = smov [#allocation2]  }
  0x53   :  { %s832_s26 = sshll.u32 %s1243_s4, 4  ;;  %s833_s26 = int_to_ptr.vmem [resolvable:$true] %s832_s26 }
  0x54   :  { %s1215_s27 = scalar_lea.vmem %s833_s26, 32  ;;  %p1220_p1 = scmp.lt.s32.totalorder %s833_s26, %s833_s26 }
  0x55   :  { %p1216_p0 = scmp.ne.s32.totalorder %s833_s26, %s1215_s27  ;;  %p1221_p2 = scmp.lt.s32.totalorder %s1215_s27, %s1215_s27 }
  0x57   :  { %p1222_p3 = por %p1221_p2, %p1220_p1 }
  0x59   :  { %p1223_p4 = pnand %p1222_p3, %p1216_p0 }
  0x88   :  { %v459_v18 = vpop.permute.xlu1 %458 }
  0x89   :  { %v439_v19 = vpop.permute.xlu0 %438 }
  0x8f   :  { %v464_v20 = vpop.permute.xlu1 %463 }
  0x90   :  { %v444_v24 = vpop.permute.xlu0 %443 }
  0x93   :  { %v454_v37 = vpop.permute.xlu1 %453 }
  0x94   :  { %v449_v39 = vpop.permute.xlu0 %448 }
  0x97   :  { %v474_v60 = vpop.permute.xlu1 %473 }
  0x98   :  { %v469_v63 = vpop.permute.xlu0 %468 }
  0x9e   :  { %v508_v12 = vpop.permute.xlu1 %507 }
  0x9f   :  { %v503_v13 = vpop.permute.xlu0 %502 }
  0xa2   :  { %v671_v14 = vpop.permute.xlu1 %670 }
  0xa3   :  { %v676_v15 = vpop.permute.xlu0 %675 }
  0xa6   :  { %v513_v16 = vpop.permute.xlu1 %512 }
  0xa7   :  { %v681_v17 = vpop.permute.xlu0 %680 }
 0x117   :  { %v998_v21 = vpop.f32.mrb[0].mxu1 }
 0x118   :  { %v1042_v22 = vpop.f32.mrb[0].mxu0  ;;  %v211_v23 = vpop.f32.mrb[1].mxu1 }
 0x119   :  { %v395_v25 = vadd.f32 %v1042_v22, %v998_v21  ;;  %v389_v26 = vpop.f32.mrb[1].mxu0 }
 0x11a   :  { %v390_v27 = vadd.f32 %v389_v26, %v211_v23 }
 0x11b   :  { %v477_v28 = vadd.f32 %v444_v24, %v395_v25  ;;  %v1001_v29 = vpop.f32.mrb[2].mxu1 }
 0x11c   :  { %v476_v30 = vadd.f32 %v439_v19, %v390_v27  ;;  %v1045_v31 = vpop.f32.mrb[2].mxu0  ;;  %v221_v32 = vpop.f32.mrb[3].mxu1 }
 0x11d   :  { %v485_v33 = vmax.f32 %v477_v28, 0.0  ;;  %v405_v34 = vadd.f32 %v1045_v31, %v1001_v29  ;;  %v399_v35 = vpop.f32.mrb[3].mxu0  ;;  %v624_v19 = vpop.permute.xlu0 %623 }
 0x11e   :  { %v484_v36 = vmax.f32 %v476_v30, 0.0  ;;  %v400_v38 = vadd.f32 %v399_v35, %v221_v32 }
 0x11f   :  { %v479_v40 = vadd.f32 %v454_v37, %v405_v34  ;;  %v1004_v41 = vpop.f32.mrb[4].mxu1 }
 0x120   :  { %v478_v42 = vadd.f32 %v449_v39, %v400_v38  ;;  %v1048_v43 = vpop.f32.mrb[4].mxu0  ;;  %v231_v44 = vpop.f32.mrb[5].mxu1  ;;  %v1176_v45 = vpack.c.bf16 %v485_v33, %v484_v36 }
 0x121   :  { %v487_v46 = vmax.f32 %v479_v40, 0.0  ;;  %v415_v47 = vadd.f32 %v1048_v43, %v1004_v41  ;;  %v409_v48 = vpop.f32.mrb[5].mxu0  ;;  %v791_v21 = vpop.permute.xlu0 %790 }
 0x122   :  { %v486_v49 = vmax.f32 %v478_v42, 0.0  ;;  %v410_v50 = vadd.f32 %v409_v48, %v231_v44  ;;  %1177 = vmatprep.subr.bf16.mxu0 %v1176_v45 }
 0x123   :  { %v481_v51 = vadd.f32 %v464_v20, %v415_v47  ;;  %1179 = vmatpush3.bf16.msra.mxu0 %v1176_v45  ;;  %v1007_v52 = vpop.f32.mrb[6].mxu1 }
 0x124   :  { %v480_v53 = vadd.f32 %v459_v18, %v410_v50  ;;  %v1051_v54 = vpop.f32.mrb[6].mxu0  ;;  %v241_v55 = vpop.f32.mrb[7].mxu1  ;;  %v1180_v56 = vpack.c.bf16 %v487_v46, %v486_v49 }
 0x125   :  { %v489_v57 = vmax.f32 %v481_v51, 0.0  ;;  %v425_v58 = vadd.f32 %v1051_v54, %v1007_v52  ;;  %v419_v59 = vpop.f32.mrb[7].mxu0  ;;  %v518_v18 = vpop.permute.xlu1 %517 }
 0x126   :  { %v488_v61 = vmax.f32 %v480_v53, 0.0  ;;  %v420_v62 = vadd.f32 %v419_v59, %v241_v55  ;;  %1181 = vmatprep.subr.bf16.mxu0 %v1180_v56  ;;  %v632_v28 = vpop.permute.xlu0 %631 }
 0x127   :  { %v483_v0 = vadd.f32 %v474_v60, %v425_v58  ;;  %1183 = vmatpush3.bf16.msra.mxu0 %v1180_v56 }
 0x128   :  { %v482_v2 = vadd.f32 %v469_v63, %v420_v62  ;;  %v1184_v3 = vpack.c.bf16 %v489_v57, %v488_v61 }
 0x129   :  { %v491_v5 = vmax.f32 %v483_v0, 0.0  ;;  %v628_v20 = vpop.permute.xlu1 %627 }
 0x12a   :  { %v490_v6 = vmax.f32 %v482_v2, 0.0  ;;  %1061 = vmatmul.mubr.msk.f32.vlgmr.msra.gmra.mrb[8].mxu0 %vm520_vm4, %v493_v1  ;;  %1185 = vmatprep.subr.bf16.mxu1 %v1184_v3  ;;  %v636_v41 = vpop.permute.xlu0 %635 }
 0x12b   :  { %1187 = vmatpush3.bf16.msra.mxu1 %v1184_v3  ;;  %1063 = vmatprep.mubr.msk.f32.mxu0 %vm520_vm4, %v494_v4 }
 0x12c   :  { %v1188_v8 = vpack.c.bf16 %v491_v5, %v490_v6 }
 0x12d   :  { %v686_v25 = vpop.permute.xlu1 %685 }
 0x12e   :  { %1064 = vmatmul.mubr.msk.f32.gmra.mrb[10].mxu0 %vm520_vm4, %v495_v7  ;;  %1189 = vmatprep.subr.bf16.mxu1 %v1188_v8 }
 0x12f   :  { %1191 = vmatpush3.bf16.msra.mxu1 %v1188_v8  ;;  %v655_v8 = vpop.permute.xlu0 %654 }
 0x131   :  { %v795_v36 = vpop.permute.xlu1 %794 }
 0x132   :  { %1075 = vmatmul.mubr.msk.f32.vlgmr.msra.gmra.mrb[8].mxu1 %vm520_vm4, %v893_v9 }
 0x133   :  { %1077 = vmatprep.mubr.msk.f32.mxu1 %vm520_vm4, %v894_v10 }
 0x135   :  { %v799_v54 = vpop.permute.xlu1 %798 }
 0x136   :  { %1078 = vmatmul.mubr.msk.f32.gmra.mrb[10].mxu1 %vm520_vm4, %v895_v11 }
 0x139   :  { %v803_v0 = vpop.permute.xlu1 %802 }
 0x1fd   :  { %v1062_v22 = vpop.f32.mrb[8].mxu0 }
 0x1fe   :  { %v605_v23 = vadd.f32 %v1062_v22, %v508_v12  ;;  %v599_v24 = vpop.f32.mrb[9].mxu0 }
 0x1ff   :  { %v600_v26 = vadd.f32 %v599_v24, %v503_v13 }
 0x200   :  { %v619_v27 = vmax.f32 %v605_v23, 0.0 }
 0x201   :  { %v618_v29 = vmax.f32 %v600_v26, 0.0  ;;  %v1065_v30 = vpop.f32.mrb[10].mxu0 }
 0x202   :  { %v639_v31 = vmul.f32 %v628_v20, %v619_v27  ;;  %v615_v32 = vadd.f32 %v1065_v30, %v518_v18  ;;  %v609_v33 = vpop.f32.mrb[11].mxu0 }
 0x203   :  { %v638_v34 = vmul.f32 %v624_v19, %v618_v29  ;;  %v610_v35 = vadd.f32 %v609_v33, %v513_v16 }
 0x204   :  { %v621_v38 = vmax.f32 %v615_v32, 0.0 }
 0x205   :  { %v642_v37 = vadd.f32 %v639_v31, %v638_v34  ;;  %v620_v39 = vmax.f32 %v610_v35, 0.0  ;;  %v1076_v40 = vpop.f32.mrb[8].mxu1 }
 0x206   :  { %v772_v42 = vadd.f32 %v1076_v40, %v676_v15  ;;  %v766_v43 = vpop.f32.mrb[9].mxu1  ;;  %v641_v47 = vmul.f32 %v636_v41, %v621_v38  ;;  %v822_v15 = vpop.permute.xlu1 %821 }
 0x207   :  { %v640_v44 = vmul.f32 %v632_v28, %v620_v39  ;;  %v767_v45 = vadd.f32 %v766_v43, %v671_v14 }
 0x208   :  { %v786_v46 = vmax.f32 %v772_v42, 0.0 }
 0x209   :  { %v643_v48 = vadd.f32 %v642_v37, %v640_v44  ;;  %v785_v49 = vmax.f32 %v767_v45, 0.0  ;;  %v1079_v50 = vpop.f32.mrb[10].mxu1 }
 0x20a   :  { %v806_v51 = vmul.f32 %v795_v36, %v786_v46  ;;  %v782_v52 = vadd.f32 %v1079_v50, %v686_v25  ;;  %v776_v53 = vpop.f32.mrb[11].mxu1 }
 0x20b   :  { %v644_v55 = vadd.f32 %v643_v48, %v641_v47  ;;  %v805_v56 = vmul.f32 %v791_v21, %v785_v49  ;;  %v777_v57 = vadd.f32 %v776_v53, %v681_v17 }
 0x20c   :  { %v788_v60 = vmax.f32 %v782_v52, 0.0 }
 0x20d   :  { %v645_v58 = vrot.slane %v644_v55, 4  ;;  %v809_v59 = vadd.f32 %v806_v51, %v805_v56  ;;  %v787_v61 = vmax.f32 %v777_v57, 0.0 }
 0x20e   :  { %v808_v2 = vmul.f32 %v803_v0, %v788_v60 }
 0x20f   :  { %v646_v62 = vadd.f32 %v645_v58, %v644_v55  ;;  %v807_v63 = vmul.f32 %v799_v54, %v787_v61 }
 0x211   :  { %v810_v1 = vadd.f32 %v809_v59, %v807_v63  ;;  %v647_v3 = vrot.slane %v646_v62, 2 }
 0x213   :  { %v811_v4 = vadd.f32 %v810_v1, %v808_v2  ;;  %v648_v5 = vadd.f32 %v647_v3, %v646_v62 }
 0x215   :  { %v812_v6 = vrot.slane %v811_v4, 4  ;;  %v649_v7 = vrot.slane %v648_v5, 1 }
 0x217   :  { %v813_v9 = vadd.f32 %v812_v6, %v811_v4  ;;  %v650_v10 = vadd.f32 %v649_v7, %v648_v5 }
 0x219   :  { %v657_v11 = vadd.f32 %v655_v8, %v650_v10  ;;  %v814_v12 = vrot.slane %v813_v9, 2 }
 0x21b   :  { %658 = vst [vmem:[#allocation2] sm:$0x1] %v657_v11  ;;  %v815_v13 = vadd.f32 %v814_v12, %v813_v9 }
 0x21d   :  { %v816_v14 = vrot.slane %v815_v13, 1 }
 0x21f   :  { %v817_v16 = vadd.f32 %v816_v14, %v815_v13 }
 0x221   :  { %v824_v17 = vadd.f32 %v822_v15, %v817_v16 }
 0x223   :  { %825 = vst [vmem:[#allocation2 + $0x1] sm:$0x1] %v824_v17 }
 0x224   :  { %1226 = shalt.err (!%p1223_p4)
}
 0x225   :  { %s1227_s30 = scalar_lea.hbm %s1635_s6, 32 }
 0x226   :  { %p1228_p5 = scmp.ne.s32.totalorder %s1635_s6, %s1227_s30  ;;  %p1231_p6 = scmp.lt.u32.totalorder %s1227_s30, %s1635_s6 }
 0x228   :  { %p1233_p7 = pnand %p1231_p6, %p1228_p5 }
 0x22a   :  { %1236 = shalt.err (!%p1233_p7)
}
 0x22b   :  { %835 = dma.vmem_to_hbm [thread:$0]  %s833_s26, 32, %s1635_s6, [#allocation3]  }
 0x22c   :  { %1237 = dma.done.wait [#allocation3], 32  }
 0x22d   :  { %1238 = vsyncadd [#allocation3], 4294967264 }
 0x22e   :  { %839 = vsyncpa [#allocation3], 1 }

</bundles_post_ra>
